<compile_context>
chip_gen: v7x
topology: tpu7x:2x2x1
jax: 0.10.0
libtpu: 0.0.40
codegen_flags: <defaults>
</compile_context>

<pallas_src>
import functools

import jax
import jax.numpy as jnp
from jax.experimental import pallas as pl
from jax.experimental.pallas import tpu as pltpu


def _ceil_div(a, b):
    return -(-a // b)


def _device_caps():
    """Generation-aware tuning knobs (tile budget, VMEM limit, #TensorCores)."""
    kind = ""
    try:
        d = jax.devices()[0]
        if d.platform == "tpu":
            kind = d.device_kind.lower()
    except Exception:
        pass
    if "v7" in kind:
        # 64 MiB physical VMEM per TensorCore, 2 TensorCores per chip.
        return dict(two_cores=True, vmem_limit=48 << 20, tile_budget=8 << 20)
    if "v5p" in kind or "v4" in kind:
        # 128 MiB VMEM, megacore (2 TensorCores).
        return dict(two_cores=True, vmem_limit=80 << 20, tile_budget=12 << 20)
    if "v6" in kind or "v5" in kind:
        # v5e / v6e: 128 MiB physical VMEM, single TensorCore.
        return dict(two_cores=False, vmem_limit=80 << 20, tile_budget=12 << 20)
    # Unknown device: stay close to the scoped-VMEM defaults.
    return dict(two_cores=False, vmem_limit=32 << 20, tile_budget=4 << 20)


def _elbo_partial_kernel(logp_ref, tgt_ref, out_ref, acc_ref, *,
                         num_tiles, tiles_per_shard):
    """Accumulate sum_i log p[i, target[i]] over this shard's row tiles.

    logp_ref: (TILE_N, C) log-probabilities in their native dtype (f32 or bf16)
    tgt_ref:  (TILE_N, 1) int32 class indices (-1 marks padding rows)
    out_ref:  (8, 128) f32 per-shard output block (all elements = shard partial sum)
    acc_ref:  (TILE_N, 1) f32 VMEM accumulator scratch
    """
    s = pl.program_id(0)   # shard (parallel across TensorCores)
    t = pl.program_id(1)   # row tile within shard (reduction axis)

    @pl.when(t == 0)
    def _init():
        acc_ref[...] = jnp.zeros_like(acc_ref)

    # Skip compute entirely on clamp-duplicated overflow tiles (only possible when
    # num_shards does not divide num_tiles).  One scalar compare; effectively free.
    @pl.when(s * tiles_per_shard + t < num_tiles)
    def _accumulate():
        logp = logp_ref[...]                               # (TILE_N, C), native dtype
        tgt = tgt_ref[...]                                 # (TILE_N, 1) int32

        tile_rows, c = logp.shape
        col_ids = jax.lax.broadcasted_iota(jnp.int32, (tile_rows, c), 1)

        # One-hot gather via iota compare + select (VPU), in the input dtype.
        # Padding rows have tgt == -1, so the mask is all-False there.
        picked = jnp.where(col_ids == tgt, logp, jnp.zeros_like(logp))

        # Lane (class) reduce per row; exact even in bf16 (one nonzero per row).
        row_sums = jnp.sum(picked, axis=1, keepdims=True).astype(jnp.float32)
        acc_ref[...] += row_sums                           # (TILE_N, 1), no XLU reduce

    @pl.when(t == pl.num_programs(1) - 1)
    def _finalize():
        total = jnp.sum(acc_ref[...], keepdims=True)       # single cross-sublane reduce
        out_ref[...] = jnp.broadcast_to(total, out_ref.shape)


def elbo_pallas(log_probs, target, kl, beta, train_size, *,
                tile_n=None, num_shards=None):
    """ELBO forward: nll_loss(log_probs, target, 'mean') * train_size + beta * kl."""
    n, c = log_probs.shape
    assert n < 2**31, "row index arithmetic uses int32"
    itemsize = jnp.dtype(log_probs.dtype).itemsize
    caps = _device_caps()

    # Sublane alignment for the native tile of this dtype (f32: 8, bf16: 16, int8/fp8: 32).
    align = 8 if itemsize >= 4 else (16 if itemsize == 2 else 32)

    if tile_n is None:
        # Grow the log-prob tile up to the device budget (several MiB), capped at 4096
        # rows so the (TILE_N, 1) target/accumulator buffers (lane-padded to 128) stay
        # small; double-buffered totals remain well inside the chosen VMEM limit.
        tile_n = caps["tile_budget"] // (c * itemsize)
        tile_n = max(align, min(4096, (tile_n // align) * align))
    tile_n = min(tile_n, _ceil_div(n, align) * align)
    tile_n = max(align, (tile_n // align) * align)

    num_tiles = _ceil_div(n, tile_n)
    if num_shards is None:
        # Split across TensorCores only on chips that actually have two of them.
        num_shards = 2 if (caps["two_cores"] and num_tiles >= 2) else 1
    num_shards = max(1, min(num_shards, num_tiles))
    tiles_per_shard = _ceil_div(num_tiles, num_shards)
    last_block = num_tiles - 1

    # Pad the (tiny) target array with -1 so tail rows never match the one-hot compare;
    # log_probs is left untouched (the last block may extend past N, never selected).
    padded_rows = num_tiles * tile_n
    tgt2d = target.astype(jnp.int32).reshape(n, 1)
    if padded_rows != n:
        tgt2d = jnp.pad(tgt2d, ((0, padded_rows - n), (0, 0)), constant_values=-1)

    def row_map(s, t):
        # Clamp so no DMA window starts past the array end; duplicated tiles (if any)
        # are skipped by the in-kernel validity guard.
        return (jnp.minimum(s * tiles_per_shard + t, last_block), 0)

    kernel = functools.partial(
        _elbo_partial_kernel,
        num_tiles=num_tiles, tiles_per_shard=tiles_per_shard)

    cost = pl.CostEstimate(
        flops=3 * n * c,                                   # compare + select + add
        transcendentals=0,
        bytes_accessed=n * c * itemsize + padded_rows * 4 + num_shards * 8 * 128 * 4,
    )

    partial_blocks = pl.pallas_call(
        kernel,
        out_shape=jax.ShapeDtypeStruct((num_shards * 8, 128), jnp.float32),
        grid_spec=pltpu.PrefetchScalarGridSpec(
            num_scalar_prefetch=0,
            grid=(num_shards, tiles_per_shard),
            in_specs=[
                pl.BlockSpec((tile_n, c), row_map),   # log_probs tile (native dtype)
                pl.BlockSpec((tile_n, 1), row_map),   # target tile
            ],
            out_specs=pl.BlockSpec((8, 128), lambda s, t: (s, 0)),
            scratch_shapes=[pltpu.VMEM((tile_n, 1), jnp.float32)],
        ),
        compiler_params=pltpu.CompilerParams(
            dimension_semantics=("parallel", "arbitrary"),
            vmem_limit_bytes=caps["vmem_limit"],
        ),
        cost_estimate=cost,
    )(log_probs, tgt2d)

    # Scalar epilogue (folded constants): every element of shard s's (8,128) block
    # equals that shard's partial sum of gathered log-probs.
    picked_sum = jnp.sum(partial_blocks[0::8, 0])
    scale = jnp.float32(-float(train_size) / n)      # nll mean * train_size, sign folded
    beta_kl = jnp.asarray(beta, jnp.float32) * jnp.asarray(kl, jnp.float32)
    return picked_sum * scale + beta_kl


class ELBO:
    """Thin analog of the PyTorch module."""

    def __init__(self, train_size):
        self.train_size = train_size

    def __call__(self, input, target, kl, beta):
        return elbo_pallas(input, target, kl, beta, self.train_size)


def elbo_reference(log_probs, target, kl, beta, train_size):
    # Pure-JAX reference mirroring F.nll_loss(reduction='mean') * train_size + beta * kl
    picked = jnp.take_along_axis(log_probs, target[:, None].astype(jnp.int32), axis=1)
    nll_mean = -jnp.mean(picked)
    return nll_mean * train_size + beta * kl


if __name__ == "__main__":
    key = jax.random.PRNGKey(0)
    k1, k2, k3 = jax.random.split(key, 3)

    # Small demo consistent with the module: batch=8, num_classes=32, train_size=1000.
    N, C = 8, 32
    train_size = 1000.0

    logits = jax.random.normal(k1, (N, C), dtype=jnp.float32)
    log_probs = jax.nn.log_softmax(logits, axis=-1)
    target = jax.random.randint(k2, (N,), 0, C, dtype=jnp.int32)
    kl = jax.random.uniform(k3, (), dtype=jnp.float32) * 10.0
    beta = jnp.float32(0.01)

    elbo = ELBO(train_size)
    out = jax.block_until_ready(elbo(log_probs, target, kl, beta))
    ref = elbo_reference(log_probs, target, kl, beta, train_size)
    assert jnp.allclose(out, ref, rtol=1e-5, atol=1e-5), (out, ref)

    # Second check: bf16 input, N not a multiple of the tile, multi-tile 2-shard grid
    # (exercises pipelining, the padded-target tail and the shard partial-sum path).
    N2, C2 = 20, 48
    k4, k5, k6 = jax.random.split(jax.random.PRNGKey(1), 3)
    logits2 = jax.random.normal(k4, (N2, C2), dtype=jnp.float32)
    log_probs2 = jax.nn.log_softmax(logits2, axis=-1).astype(jnp.bfloat16)
    target2 = jax.random.randint(k5, (N2,), 0, C2, dtype=jnp.int32)
    kl2 = jax.random.uniform(k6, (), dtype=jnp.float32) * 5.0

    out2 = elbo_pallas(log_probs2, target2, kl2, beta, train_size,
                       tile_n=16, num_shards=2)
    out2 = jax.block_until_ready(out2)
    ref2 = elbo_reference(log_probs2.astype(jnp.float32), target2, kl2, beta, train_size)
    assert jnp.allclose(out2, ref2, rtol=1e-4, atol=1e-3), (out2, ref2)

    print("KERNEL_OK")
</pallas_src>

<mosaic_0001>
module attributes {stable_mosaic.version = 11 : i64} {
  func.func @_elbo_partial_kernel(%arg0: i32, %arg1: i32, %arg2: memref<8x32xf32, #tpu.memory_space<vmem>>, %arg3: memref<8x1xi32, #tpu.memory_space<vmem>>, %arg4: memref<8x128xf32, #tpu.memory_space<vmem>>, %arg5: memref<8x1xf32, #tpu.memory_space<vmem>>) attributes {dimension_semantics = [#tpu.dimension_semantics<parallel>, #tpu.dimension_semantics<arbitrary>], iteration_bounds = array<i64: 1, 1>, scalar_prefetch = 0 : i64, scratch_operands = 1 : i64, tpu.core_type = #tpu.core_type<tc>, window_params = [{transform_indices = @transform_0, window_bounds = array<i64: 8, 32>}, {transform_indices = @transform_1, window_bounds = array<i64: 8, 1>}, {transform_indices = @transform_2, window_bounds = array<i64: 8, 128>}]} {
    %c0_i32 = arith.constant 0 : i32
    %0 = arith.cmpi eq, %arg1, %c0_i32 : i32
    %1 = arith.extui %0 : i1 to i32
    %c0_i32_0 = arith.constant 0 : i32
    %2 = arith.cmpi ne, %1, %c0_i32_0 : i32
    scf.if %2 {
      %cst = arith.constant 0.000000e+00 : f32
      %11 = vector.broadcast %cst : f32 to vector<8x1xf32>
      %c0 = arith.constant 0 : index
      %c0_5 = arith.constant 0 : index
      %12 = vector.load %arg5[%c0, %c0_5] : memref<8x1xf32, #tpu.memory_space<vmem>>, vector<8x1xf32>
      tpu.vector_store %arg5[%c0, %c0_5], %11 {strides = array<i32>} : memref<8x1xf32, #tpu.memory_space<vmem>>, vector<8x1xf32>,
    } else {
    }
    %c1_i32 = arith.constant 1 : i32
    %3 = arith.muli %arg0, %c1_i32 : i32
    %4 = arith.addi %3, %arg1 : i32
    %c1_i32_1 = arith.constant 1 : i32
    %5 = arith.cmpi slt, %4, %c1_i32_1 : i32
    %6 = arith.extui %5 : i1 to i32
    %c0_i32_2 = arith.constant 0 : i32
    %7 = arith.cmpi ne, %6, %c0_i32_2 : i32
    scf.if %7 {
      %c0 = arith.constant 0 : index
      %c0_5 = arith.constant 0 : index
      %11 = vector.load %arg2[%c0, %c0_5] : memref<8x32xf32, #tpu.memory_space<vmem>>, vector<8x32xf32>
      %c0_6 = arith.constant 0 : index
      %c0_7 = arith.constant 0 : index
      %12 = vector.load %arg3[%c0_6, %c0_7] : memref<8x1xi32, #tpu.memory_space<vmem>>, vector<8x1xi32>
      %13 = tpu.iota {dimensions = array<i32: 1>} : vector<8x32xi32>
      %14 = vector.broadcast %12 : vector<8x1xi32> to vector<8x32xi32>
      %15 = arith.cmpi eq, %13, %14 : vector<8x32xi32>
      %cst = arith.constant 0.000000e+00 : f32
      %16 = vector.broadcast %cst : f32 to vector<8x32xf32>
      %17 = arith.select %15, %11, %16 : vector<8x32xi1>, vector<8x32xf32>
      %cst_8 = arith.constant dense<0.000000e+00> : vector<8xf32>
      %18 = vector.multi_reduction <add>, %17, %cst_8 [1] : vector<8x32xf32> to vector<8xf32>
      %19 = vector.shape_cast %18 : vector<8xf32> to vector<8x1xf32>
      %c0_9 = arith.constant 0 : index
      %c0_10 = arith.constant 0 : index
      %20 = vector.load %arg5[%c0_9, %c0_10] : memref<8x1xf32, #tpu.memory_space<vmem>>, vector<8x1xf32>
      %21 = arith.addf %20, %19 : vector<8x1xf32>
      %c0_11 = arith.constant 0 : index
      %c0_12 = arith.constant 0 : index
      %22 = vector.load %arg5[%c0_11, %c0_12] : memref<8x1xf32, #tpu.memory_space<vmem>>, vector<8x1xf32>
      tpu.vector_store %arg5[%c0_11, %c0_12], %21 {strides = array<i32>} : memref<8x1xf32, #tpu.memory_space<vmem>>, vector<8x1xf32>,
    } else {
    }
    %c0_i32_3 = arith.constant 0 : i32
    %8 = arith.cmpi eq, %arg1, %c0_i32_3 : i32
    %9 = arith.extui %8 : i1 to i32
    %c0_i32_4 = arith.constant 0 : i32
    %10 = arith.cmpi ne, %9, %c0_i32_4 : i32
    scf.if %10 {
      %c0 = arith.constant 0 : index
      %c0_5 = arith.constant 0 : index
      %11 = vector.load %arg5[%c0, %c0_5] : memref<8x1xf32, #tpu.memory_space<vmem>>, vector<8x1xf32>
      %12 = vector.shape_cast %11 : vector<8x1xf32> to vector<1x8x1xf32>
      %cst = arith.constant dense<0.000000e+00> : vector<1xf32>
      %13 = vector.multi_reduction <add>, %12, %cst [1, 2] : vector<1x8x1xf32> to vector<1xf32>
      %14 = vector.shape_cast %13 : vector<1xf32> to vector<1x1x1xf32>
      %15 = vector.extract %14[0, 0, 0] : f32 from vector<1x1x1xf32>
      %16 = vector.broadcast %15 : f32 to vector<1x1xf32>
      %17 = vector.shape_cast %16 : vector<1x1xf32> to vector<1x1xf32>
      %18 = vector.broadcast %17 : vector<1x1xf32> to vector<8x128xf32>
      %c0_6 = arith.constant 0 : index
      %c0_7 = arith.constant 0 : index
      %19 = vector.load %arg4[%c0_6, %c0_7] : memref<8x128xf32, #tpu.memory_space<vmem>>, vector<8x128xf32>
      tpu.vector_store %arg4[%c0_6, %c0_7], %18 {strides = array<i32>} : memref<8x128xf32, #tpu.memory_space<vmem>>, vector<8x128xf32>,
    } else {
    }
    return
  }
  func.func @transform_0(%arg0: i32, %arg1: i32) -> (i32, i32) {
    %c1_i32 = arith.constant 1 : i32
    %0 = arith.muli %arg0, %c1_i32 : i32
    %1 = arith.addi %0, %arg1 : i32
    %c0_i32 = arith.constant 0 : i32
    %2 = arith.minsi %1, %c0_i32 : i32
    %c0_i32_0 = arith.constant 0 : i32
    %c0_i32_1 = arith.constant 0 : i32
    return %2, %c0_i32_0 : i32, i32
  }
  func.func @transform_1(%arg0: i32, %arg1: i32) -> (i32, i32) {
    %c1_i32 = arith.constant 1 : i32
    %0 = arith.muli %arg0, %c1_i32 : i32
    %1 = arith.addi %0, %arg1 : i32
    %c0_i32 = arith.constant 0 : i32
    %2 = arith.minsi %1, %c0_i32 : i32
    %c0_i32_0 = arith.constant 0 : i32
    %c0_i32_1 = arith.constant 0 : i32
    return %2, %c0_i32_0 : i32, i32
  }
  func.func @transform_2(%arg0: i32, %arg1: i32) -> (i32, i32) {
    %c0_i32 = arith.constant 0 : i32
    %c0_i32_0 = arith.constant 0 : i32
    return %arg0, %c0_i32 : i32, i32
  }
}

</mosaic_0001>

<bundles_post_ra>
// kernel: tpu_custom_call.1
= control target key start
LH: loop header
LB: loop body
LE: loop exit
PB: predicated region body
PF: predicated region fallthrough
CT: control target
= control target key end

     0   :  { %s203_s0 = inlined_call_operand.vmem [shape: f32[8,32], index: 0, kind: input, shape index: {}]   ;;  %s204_s1 = inlined_call_operand.vmem [shape: s32[8,1], index: 1, kind: input, shape index: {}]   ;;  %s205_s2 = inlined_call_operand.hbm [shape: f32[8,128], index: 2, kind: output, shape index: {}]  }
   0x1   :  { %v78_v0 = vld [vmem:[%s204_s1] sm:$0xff] }
   0x2   :  { %7 = vsyncpa [#allocation4], 0  ;;  %v167_v1 = vmov 0   ;;  %v79_v2 = vlaneseq  ;;  %v77_v4 = vld [vmem:[%s203_s0] sm:$0xff]  ;;  %vm86_vm0 = vcmask 261120   ;;  %vm70_vm2 = vcmask 7168  }
   0x3   :  { %142 = vset.pattern.permute.xlu0 %v167_v1  ;;  %v168_v8 = vmov 0.0   ;;  %s169_s0 = smov [#allocation3]  }
   0x4   :  { %82 = vperm.xlu0 %142, %v78_v0   ;;  %v80_v3 = vand.u32 127, %v79_v2  ;;  %71 = vst.msk [vmem:[#allocation2] sm:$0xff] %vm70_vm2, %v168_v8  ;;  %s117_s1 = sshll.u32 %s169_s0, 4  ;;  %s118_s1 = int_to_ptr.vmem [resolvable:$true] %s117_s1 }
   0x5   :  { %s143_s14 = scalar_lea.vmem %s118_s1, 128  ;;  %p148_p1 = scmp.lt.s32.totalorder %s118_s1, %s118_s1 }
   0x6   :  { %p144_p0 = scmp.ne.s32.totalorder %s118_s1, %s143_s14  ;;  %p149_p2 = scmp.lt.s32.totalorder %s143_s14, %s143_s14 }
   0x8   :  { %p150_p3 = por %p149_p2, %p148_p1 }
   0xa   :  { %p151_p4 = pnand %p150_p3, %p144_p0 }
   0xb   :  { %v90_v9 = vld [vmem:[#allocation2] sm:$0xff] }
  0x83   :  { %v83_v5 = vpop.permute.xlu0 %82 }
  0x84   :  { %vm84_vm1 = vcmp.eq.s32.totalorder %v80_v3, %v83_v5 }
  0x85   :  { %v85_v6 = vsel %vm84_vm1, %v77_v4, 0.0 }
  0x86   :  { %v87_v7 = vsel %vm86_vm0, %v85_v6, 0.0 }
  0x87   :  { %88 = vadd.xlane.f32.xlu0 %v87_v7 }
 0x114   :  { %v89_v10 = vpop.xlane.xlu0 %88 }
 0x115   :  { %v91_v11 = vadd.f32 %v90_v9, %v89_v10 }
 0x117   :  { %93 = vst.msk [vmem:[#allocation2] sm:$0xff] %vm70_vm2, %v91_v11 }
 0x11e   :  { %v97_v12 = vld [vmem:[#allocation2] sm:$0xff] }
 0x11f   :  { %v99_v13 = vsel %vm70_vm2, %v97_v12, 0.0 }
 0x120   :  { %100 = vadd.xlane.f32.xlu1 %v99_v13 }
 0x1ad   :  { %v101_v14 = vpop.xlane.xlu1 %100 }
 0x1ae   :  { %v102_v15 = vrot.slane %v101_v14, 4 }
 0x1b0   :  { %v103_v16 = vadd.f32 %v102_v15, %v101_v14 }
 0x1b2   :  { %v104_v17 = vrot.slane %v103_v16, 2 }
 0x1b4   :  { %v105_v18 = vadd.f32 %v104_v17, %v103_v16 }
 0x1b6   :  { %v106_v19 = vrot.slane %v105_v18, 1 }
 0x1b8   :  { %v107_v20 = vadd.f32 %v106_v19, %v105_v18 }
 0x1ba   :  { %137 = vpush %v107_v20 }
 0x1eb   :  { %s138_s13 = spop %137 }
 0x1ec   :  { %v109_v21 = vstv %s138_s13 }
 0x1ed   :  { %110 = vst [vmem:[#allocation3] sm:$0xff] %v109_v21 }
 0x1ee   :  { %154 = shalt.err (!%p151_p4)
}
 0x1ef   :  { %s155_s17 = scalar_lea.hbm %s205_s2, 128 }
 0x1f0   :  { %p156_p5 = scmp.ne.s32.totalorder %s205_s2, %s155_s17  ;;  %p159_p6 = scmp.lt.u32.totalorder %s155_s17, %s205_s2 }
 0x1f2   :  { %p161_p7 = pnand %p159_p6, %p156_p5 }
 0x1f4   :  { %164 = shalt.err (!%p161_p7)
}
 0x1f5   :  { %120 = dma.vmem_to_hbm [thread:$0]  %s118_s1, 128, %s205_s2, [#allocation4]  }
 0x1f6   :  { %165 = dma.done.wait [#allocation4], 128  }
 0x1f7   :  { %166 = vsyncadd [#allocation4], 4294967168 }
 0x1f8   :  { %124 = vsyncpa [#allocation4], 1 }

</bundles_post_ra>
